<compile_context>
chip_gen: v6e
topology: v6e:2x2x1
jax: 0.10.0
libtpu: 0.0.40
codegen_flags: <defaults>
</compile_context>

<pallas_src>
import jax
import jax.numpy as jnp
from jax.experimental import pallas as pl
from jax.experimental.pallas import tpu as pltpu


def attention_kernel(x_ref, w_ref, b_ref, ctx_ref, o_ref):
    # x_ref:   (Bb, T, D)  current batch block (native dtype)
    # w_ref:   (D, A)      linear weight (pre-transposed), f32
    # b_ref:   (1, A)      linear bias, f32
    # ctx_ref: (1, A)      context vector, f32
    # o_ref:   (Bb, D)     pooled output block, f32
    Bb, T, D = x_ref.shape
    A = w_ref.shape[1]

    # Single load; cast in-kernel so HBM traffic stays at x's native width.
    x = x_ref[...].astype(jnp.float32)                      # (Bb, T, D)
    x2 = x.reshape(Bb * T, D)                               # fold batch into MXU M dim

    # Projection + tanh: one (Bb*T, D) @ (D, A) MXU matmul per block, f32 acc.
    h = jnp.tanh(
        jnp.dot(x2, w_ref[...], preferred_element_type=jnp.float32) + b_ref[...]
    )                                                       # (Bb*T, A)
    h3 = h.reshape(Bb, T, A)                                # (Bb, T, A)

    # Scores with T on the lane axis -> softmax over dense vregs.
    scores = jnp.sum(h3 * ctx_ref[...], axis=-1)            # (Bb, T)

    # Numerically-stable softmax along T (un-normalized; norm folded below).
    m = jnp.max(scores, axis=-1, keepdims=True)             # (Bb, 1)
    e = jnp.exp(scores - m)                                 # (Bb, T)   (EUP)
    denom = jnp.sum(e, axis=-1, keepdims=True)              # (Bb, 1)

    # Weighted pool over T, then normalize once on the (Bb, D) result with the
    # EUP approximate reciprocal (one recip + D muls per row instead of T).
    pooled = jnp.sum(x * e[:, :, None], axis=1)             # (Bb, D)
    pooled = pooled * pl.reciprocal(denom, approx=True)     # (Bb, D)

    o_ref[...] = pooled.astype(o_ref.dtype)


def _round_up(n, m):
    return ((n + m - 1) // m) * m


def attention_forward(x, weight_t, bias, context_vector, block_b=None):
    """x: (B, T, D); weight_t: (D, A); bias: (A,); context_vector: (A,) -> (B, D) f32."""
    B, T, D = x.shape
    A = weight_t.shape[1]

    if block_b is None:
        # Target ~2 MiB x tiles: amortizes per-step overhead, keeps the
        # double-buffered pipeline well under the scoped-VMEM default on
        # v5e/v6e/v7x, at least 8 rows for a sublane-dense output store and
        # Bb*T >= 256 to fill the MXU M dimension, but never more than the batch.
        elem_bytes = jnp.dtype(x.dtype).itemsize
        row_bytes = max(T * D * elem_bytes, 1)
        target = max(8, pl.cdiv(256, T), (2 * 1024 * 1024) // row_bytes)
        block_b = min(_round_up(B, 8), _round_up(target, 8))
    block_b = max(8, _round_up(block_b, 8))

    # Pad batch to a multiple of the block size; padded rows (all-zero x) yield
    # a uniform softmax over zeros -> pooled zeros, and are sliced off below.
    Bp = _round_up(B, block_b)
    if Bp != B:
        x = jnp.pad(x, ((0, Bp - B), (0, 0), (0, 0)))

    w = weight_t.astype(jnp.float32)
    b2 = bias.reshape(1, A).astype(jnp.float32)
    c2 = context_vector.reshape(1, A).astype(jnp.float32)

    out = pl.pallas_call(
        attention_kernel,
        out_shape=jax.ShapeDtypeStruct((Bp, D), jnp.float32),
        grid_spec=pl.GridSpec(
            grid=(Bp // block_b,),
            in_specs=[
                pl.BlockSpec((block_b, T, D), lambda i: (i, 0, 0)),
                pl.BlockSpec((D, A), lambda i: (0, 0)),
                pl.BlockSpec((1, A), lambda i: (0, 0)),
                pl.BlockSpec((1, A), lambda i: (0, 0)),
            ],
            out_specs=pl.BlockSpec((block_b, D), lambda i: (i, 0)),
        ),
        compiler_params=pltpu.CompilerParams(
            dimension_semantics=("parallel",),
        ),
    )(x, w, b2, c2)
    return out[:B]


def attention_ref(x, weight_t, bias, context_vector):
    """Pure-JAX reference mirroring the PyTorch forward."""
    h = jnp.tanh(jnp.einsum("btd,da->bta", x, weight_t) + bias)   # (B, T, A)
    scores = jnp.einsum("bta,a->bt", h, context_vector)           # (B, T)
    w = jax.nn.softmax(scores, axis=-1)[..., None]                # (B, T, 1)
    return jnp.sum(x * w, axis=1)                                 # (B, D)


if __name__ == "__main__":
    B, T, D, A = 2, 8, 32, 16   # batch, seq, input_dim, attention_dim

    key = jax.random.PRNGKey(0)
    k_x, k_w, k_b, k_c = jax.random.split(key, 4)

    x = jax.random.normal(k_x, (B, T, D), dtype=jnp.float32)
    # nn.Linear(input_dim, attention_dim): weight (A, D), bias (A,)
    weight = jax.random.normal(k_w, (A, D), dtype=jnp.float32) * 0.1
    bias = jax.random.normal(k_b, (A,), dtype=jnp.float32) * 0.1
    context_vector = jax.random.normal(k_c, (A,), dtype=jnp.float32)

    weight_t = weight.T  # (D, A) for x @ W

    out = attention_forward(x, weight_t, bias, context_vector)
    out = jax.block_until_ready(out)

    ref = attention_ref(x, weight_t, bias, context_vector)
    assert out.shape == (B, D), out.shape
    # Tolerance accounts for the EUP approximate reciprocal in the softmax norm.
    assert jnp.allclose(out, ref, atol=5e-3, rtol=5e-3), (
        f"max abs err {jnp.max(jnp.abs(out - ref))}"
    )

    print("KERNEL_OK")
</pallas_src>

<mosaic_0001>
module attributes {stable_mosaic.version = 11 : i64} {
  func.func @attention_kernel(%arg0: i32, %arg1: memref<8x8x32xf32, #tpu.memory_space<vmem>>, %arg2: memref<32x16xf32, #tpu.memory_space<vmem>>, %arg3: memref<1x16xf32, #tpu.memory_space<vmem>>, %arg4: memref<1x16xf32, #tpu.memory_space<vmem>>, %arg5: memref<8x32xf32, #tpu.memory_space<vmem>>) attributes {dimension_semantics = [#tpu.dimension_semantics<parallel>], iteration_bounds = array<i64: 1>, scalar_prefetch = 0 : i64, scratch_operands = 0 : i64, tpu.core_type = #tpu.core_type<tc>, window_params = [{transform_indices = @transform_0, window_bounds = array<i64: 8, 8, 32>}, {pipeline_mode = #tpu.pipeline_mode<synchronous>, transform_indices = @transform_1, window_bounds = array<i64: 32, 16>}, {pipeline_mode = #tpu.pipeline_mode<synchronous>, transform_indices = @transform_2, window_bounds = array<i64: 1, 16>}, {pipeline_mode = #tpu.pipeline_mode<synchronous>, transform_indices = @transform_3, window_bounds = array<i64: 1, 16>}, {transform_indices = @transform_4, window_bounds = array<i64: 8, 32>}]} {
    %c0 = arith.constant 0 : index
    %c0_0 = arith.constant 0 : index
    %c0_1 = arith.constant 0 : index
    %0 = vector.load %arg1[%c0, %c0_0, %c0_1] : memref<8x8x32xf32, #tpu.memory_space<vmem>>, vector<8x8x32xf32>
    %1 = vector.shape_cast %0 : vector<8x8x32xf32> to vector<64x32xf32>
    %c0_2 = arith.constant 0 : index
    %c0_3 = arith.constant 0 : index
    %2 = vector.load %arg2[%c0_2, %c0_3] : memref<32x16xf32, #tpu.memory_space<vmem>>, vector<32x16xf32>
    %cst = arith.constant dense<0.000000e+00> : vector<64x16xf32>
    %3 = tpu.matmul %1, %2, %cst {dimension_numbers = #tpu.dot_dimension_numbers<[1], [0], [0], [1], [0, 0, 1, 1], [], []>} : vector<64x32xf32>, vector<32x16xf32>, vector<64x16xf32> -> vector<64x16xf32>
    %c0_4 = arith.constant 0 : index
    %c0_5 = arith.constant 0 : index
    %4 = vector.load %arg3[%c0_4, %c0_5] : memref<1x16xf32, #tpu.memory_space<vmem>>, vector<1x16xf32>
    %5 = vector.broadcast %4 : vector<1x16xf32> to vector<64x16xf32>
    %6 = arith.addf %3, %5 : vector<64x16xf32>
    %7 = math.tanh %6 : vector<64x16xf32>
    %8 = vector.shape_cast %7 : vector<64x16xf32> to vector<8x8x16xf32>
    %c0_6 = arith.constant 0 : index
    %c0_7 = arith.constant 0 : index
    %9 = vector.load %arg4[%c0_6, %c0_7] : memref<1x16xf32, #tpu.memory_space<vmem>>, vector<1x16xf32>
    %10 = vector.shape_cast %9 : vector<1x16xf32> to vector<1x1x16xf32>
    %11 = vector.broadcast %10 : vector<1x1x16xf32> to vector<8x8x16xf32>
    %12 = arith.mulf %8, %11 : vector<8x8x16xf32>
    %cst_8 = arith.constant dense<0.000000e+00> : vector<8x8xf32>
    %13 = vector.multi_reduction <add>, %12, %cst_8 [2] : vector<8x8x16xf32> to vector<8x8xf32>
    %cst_9 = arith.constant dense<0xFF800000> : vector<8xf32>
    %14 = vector.multi_reduction <maximumf>, %13, %cst_9 [1] : vector<8x8xf32> to vector<8xf32>
    %15 = vector.shape_cast %14 : vector<8xf32> to vector<8x1xf32>
    %16 = vector.broadcast %15 : vector<8x1xf32> to vector<8x8xf32>
    %17 = arith.subf %13, %16 : vector<8x8xf32>
    %18 = math.exp %17 : vector<8x8xf32>
    %cst_10 = arith.constant dense<0.000000e+00> : vector<8xf32>
    %19 = vector.multi_reduction <add>, %18, %cst_10 [1] : vector<8x8xf32> to vector<8xf32>
    %20 = vector.shape_cast %19 : vector<8xf32> to vector<8x1xf32>
    %21 = vector.shape_cast %18 : vector<8x8xf32> to vector<8x8x1xf32>
    %22 = vector.broadcast %21 : vector<8x8x1xf32> to vector<8x8x32xf32>
    %23 = arith.mulf %0, %22 : vector<8x8x32xf32>
    %cst_11 = arith.constant dense<0.000000e+00> : vector<8x32xf32>
    %24 = vector.multi_reduction <add>, %23, %cst_11 [1] : vector<8x8x32xf32> to vector<8x32xf32>
    %25 = tpu.reciprocal %20 {approx = true} : vector<8x1xf32> -> vector<8x1xf32>
    %26 = vector.broadcast %25 : vector<8x1xf32> to vector<8x32xf32>
    %27 = arith.mulf %24, %26 : vector<8x32xf32>
    %c0_12 = arith.constant 0 : index
    %c0_13 = arith.constant 0 : index
    %28 = vector.load %arg5[%c0_12, %c0_13] : memref<8x32xf32, #tpu.memory_space<vmem>>, vector<8x32xf32>
    tpu.vector_store %arg5[%c0_12, %c0_13], %27 {strides = array<i32>} : memref<8x32xf32, #tpu.memory_space<vmem>>, vector<8x32xf32>,
    return
  }
  func.func @transform_0(%arg0: i32) -> (i32, i32, i32) {
    %c0_i32 = arith.constant 0 : i32
    %c0_i32_0 = arith.constant 0 : i32
    %c0_i32_1 = arith.constant 0 : i32
    return %arg0, %c0_i32, %c0_i32_0 : i32, i32, i32
  }
  func.func @transform_1(%arg0: i32) -> (i32, i32) {
    %c0_i32 = arith.constant 0 : i32
    %c0_i32_0 = arith.constant 0 : i32
    %c0_i32_1 = arith.constant 0 : i32
    return %c0_i32, %c0_i32_0 : i32, i32
  }
  func.func @transform_2(%arg0: i32) -> (i32, i32) {
    %c0_i32 = arith.constant 0 : i32
    %c0_i32_0 = arith.constant 0 : i32
    %c0_i32_1 = arith.constant 0 : i32
    return %c0_i32, %c0_i32_0 : i32, i32
  }
  func.func @transform_3(%arg0: i32) -> (i32, i32) {
    %c0_i32 = arith.constant 0 : i32
    %c0_i32_0 = arith.constant 0 : i32
    %c0_i32_1 = arith.constant 0 : i32
    return %c0_i32, %c0_i32_0 : i32, i32
  }
  func.func @transform_4(%arg0: i32) -> (i32, i32) {
    %c0_i32 = arith.constant 0 : i32
    %c0_i32_0 = arith.constant 0 : i32
    return %arg0, %c0_i32 : i32, i32
  }
}

</mosaic_0001>

<bundles_post_ra>
// kernel: tpu_custom_call.1
= control target key start
LH: loop header
LB: loop body
LE: loop exit
PB: predicated region body
PF: predicated region fallthrough
CT: control target
= control target key end

     0   :  { %9 = vsyncpa [#allocation3], 0  ;;  %s864_s0 = inlined_call_operand.hbm [shape: f32[8,8,32], index: 0, kind: input, shape index: {}]   ;;  %s865_s1 = inlined_call_operand.vmem [shape: f32[32,16], index: 1, kind: input, shape index: {}]   ;;  %s866_s2 = inlined_call_operand.vmem [shape: f32[1,16], index: 2, kind: input, shape index: {}]   ;;  %s867_s3 = inlined_call_operand.vmem [shape: f32[1,16], index: 3, kind: input, shape index: {}]   ;;  %s868_s4 = inlined_call_operand.hbm [shape: f32[8,32], index: 4, kind: output, shape index: {}]  }
   0x1   :  { %10 = vsyncpa [#allocation4], 0  ;;  %s701_s15 = smov [#allocation2]  }
   0x2   :  { %s16_s16 = sshll.u32 %s701_s15, 4  ;;  %s17_s16 = int_to_ptr.vmem [resolvable:$true] %s16_s16 }
   0x3   :  { %s665_s17 = scalar_lea.vmem %s17_s16, 1024  ;;  %p670_p1 = scmp.lt.s32.totalorder %s17_s16, %s17_s16 }
   0x4   :  { %p666_p0 = scmp.ne.s32.totalorder %s17_s16, %s665_s17  ;;  %p671_p2 = scmp.lt.s32.totalorder %s665_s17, %s665_s17 }
   0x6   :  { %p672_p3 = por %p671_p2, %p670_p1 }
   0x8   :  { %p673_p4 = pnand %p672_p3, %p666_p0 }
   0xa   :  { %676 = shalt.err (!%p673_p4)
}
   0xb   :  { %s702_s18 = smov 128   ;;  %s703_s19 = smov 8  }
   0xc   :  { %22 = dma.hbm_to_vmem [thread:$0]  %s864_s0, 1024, %s17_s16, [#allocation3], %s702_s18, %s702_s18, %s703_s19  }
   0xd   :  { %697 = dma.done.wait [#allocation3], 1024  }
   0xe   :  { %698 = vsyncadd [#allocation3], 4294966272  ;;  %vm51_vm0 = vcmask 261120   ;;  %v43_v0 = vld [vmem:[%s865_s1 + $0x18] sm:$0xff]  ;;  %v42_v1 = vld [vmem:[%s865_s1 + $0x10] sm:$0xff]  ;;  %vm204_vm1 = vcmask 130048   ;;  %v237_v54 = vlaneseq }
   0xf   :  { %588 = vmatprep.subr.mxu0 %v43_v0  ;;  %608 = vmatprep.subr.mxu1 %v43_v0  ;;  %v740_v2 = vld [vmem:[#allocation2] sm:$0xff]  ;;  %v41_v3 = vld [vmem:[%s865_s1 + $0x8] sm:$0xff]  ;;  %v752_v6 = vld [vmem:[#allocation2 + $0x10] sm:$0xff]  ;;  %vm271_vm2 = vcmask 1041409   ;;  %vm273_vm3 = vcmask 1042434   ;;  %vm275_vm4 = vcmask 1043459  }
  0x10   :  { %589 = vmatpush3.msra.mxu0 %v43_v0  ;;  %596 = vmatprep.mubr.msk.f32.mxu0 %vm51_vm0, %v740_v2  ;;  %v40_v4 = vld [vmem:[%s865_s1] sm:$0xff]  ;;  %v750_v5 = vld [vmem:[#allocation2 + $0x8] sm:$0xff]  ;;  %v760_v9 = vld [vmem:[#allocation2 + $0x30] sm:$0xff]  ;;  %v238_v55 = vand.u32 127, %v237_v54  ;;  %v792_v56 = vshrl.u32 %v237_v54, 7  ;;  %vm277_vm5 = vcmask 1044484  }
  0x11   :  { %590 = vmatprep.subr.mxu0 %v42_v1  ;;  %612 = vmatpush3.msra.mxu1 %v43_v0  ;;  %v754_v7 = vld [vmem:[#allocation2 + $0x20] sm:$0xff]  ;;  %v756_v8 = vld [vmem:[#allocation2 + $0x28] sm:$0xff]  ;;  %v764_v10 = vld [vmem:[#allocation2 + $0x18] sm:$0xff]  ;;  %vm279_vm6 = vcmask 1045509   ;;  %vm281_vm7 = vcmask 1046534   ;;  %vm283_vm8 = vcmask 1047559  }
  0x12   :  { %591 = vmatpush3.msra.mxu0 %v42_v1  ;;  %609 = vmatprep.subr.mxu1 %v42_v1  ;;  %v772_v11 = vld [vmem:[#allocation2 + $0x38] sm:$0xff]  ;;  %v566_v12 = vld [vmem:[%s866_s2] ss:$0 sm:$0xff]  ;;  %v795_v58 = vsub.s32 %v238_v55, %v792_v56  ;;  %vm286_vm9 = vcmask 64512  }
  0x13   :  { %592 = vmatprep.subr.mxu0 %v41_v3  ;;  %613 = vmatpush3.msra.mxu1 %v42_v1  ;;  %v575_v29 = vld [vmem:[%s867_s3] ss:$0 sm:$0xff]  ;;  %s705_s3 = smov [#allocation5]  }
  0x14   :  { %593 = vmatpush3.msra.mxu0 %v41_v3  ;;  %610 = vmatprep.subr.mxu1 %v41_v3  ;;  %s557_s5 = sshll.u32 %s705_s3, 4  ;;  %s558_s5 = int_to_ptr.vmem [resolvable:$true] %s557_s5 }
  0x15   :  { %594 = vmatprep.subr.mxu0 %v40_v4  ;;  %614 = vmatpush3.msra.mxu1 %v41_v3  ;;  %s677_s6 = scalar_lea.vmem %s558_s5, 128  ;;  %p682_p6 = scmp.lt.s32.totalorder %s558_s5, %s558_s5 }
  0x16   :  { %595 = vmatpush3.msra.mxu0 %v40_v4  ;;  %611 = vmatprep.subr.mxu1 %v40_v4  ;;  %p678_p5 = scmp.ne.s32.totalorder %s558_s5, %s677_s6  ;;  %p683_p7 = scmp.lt.s32.totalorder %s677_s6, %s677_s6 }
  0x17   :  { %597 = vmatmul.mubr.msk.f32.vlgmr.msra.gmra.mxu0 %vm51_vm0, %v750_v5  ;;  %615 = vmatpush3.msra.mxu1 %v40_v4 }
  0x18   :  { %599 = vmatprep.mubr.msk.f32.mxu0 %vm51_vm0, %v752_v6  ;;  %602 = vmatprep.mubr.msk.f32.mxu1 %vm51_vm0, %v754_v7  ;;  %p684_p8 = por %p683_p7, %p682_p6 }
  0x19   :  { %603 = vmatmul.mubr.msk.f32.vlgmr.msra.gmra.mxu1 %vm51_vm0, %v756_v8 }
  0x1a   :  { %605 = vmatprep.mubr.msk.f32.mxu1 %vm51_vm0, %v760_v9  ;;  %p685_p9 = pnand %p684_p8, %p678_p5 }
  0x1b   :  { %600 = vmatmul.mubr.msk.f32.gmra.mxu0 %vm51_vm0, %v764_v10 }
  0x1d   :  { %606 = vmatmul.mubr.msk.f32.gmra.mxu1 %vm51_vm0, %v772_v11 }
  0xd7   :  { %v598_v13 = vpop.f32.mrf.mxu0 }
  0xd8   :  { %v148_v14 = vadd.f32 %v598_v13, %v566_v12 }
  0xd9   :  { %v142_v15 = vpop.f32.mrf.mxu0  ;;  %v604_v16 = vpop.f32.mrf.mxu1 }
  0xda   :  { %623 = vtanh.f32 %v148_v14  ;;  %v143_v17 = vadd.f32 %v566_v12, %v142_v15  ;;  %v168_v23 = vadd.f32 %v604_v16, %v566_v12 }
  0xdb   :  { %v601_v18 = vpop.f32.mrf.mxu0  ;;  %v162_v19 = vpop.f32.mrf.mxu1 }
  0xdc   :  { %625 = vtanh.f32 %v143_v17  ;;  %v158_v20 = vadd.f32 %v601_v18, %v566_v12  ;;  %v163_v21 = vadd.f32 %v566_v12, %v162_v19 }
  0xdd   :  { %v152_v22 = vpop.f32.mrf.mxu0  ;;  %v607_v24 = vpop.f32.mrf.mxu1 }
  0xde   :  { %627 = vtanh.f32 %v158_v20  ;;  %v153_v25 = vadd.f32 %v566_v12, %v152_v22  ;;  %v178_v28 = vadd.f32 %v607_v24, %v566_v12 }
  0xdf   :  { %629 = vtanh.f32 %v163_v21  ;;  %v172_v26 = vpop.f32.mrf.mxu1 }
  0xe0   :  { %631 = vtanh.f32 %v153_v25  ;;  %v173_v27 = vadd.f32 %v566_v12, %v172_v26  ;;  %v704_v26 = vmov 0  }
  0xe1   :  { %633 = vtanh.f32 %v168_v23  ;;  %622 = vset.pattern.permute.xlu0 %v704_v26  ;;  %621 = vset.pattern.permute.xlu1 %v704_v26 }
  0xe2   :  { %635 = vtanh.f32 %v173_v27  ;;  %v293_v27 = vsub.s32 0, %v792_v56 }
  0xe3   :  { %637 = vtanh.f32 %v178_v28  ;;  %v297_v28 = vsub.s32 1, %v792_v56 }
  0xe7   :  { %v624_v30 = vpop.eup %623 }
  0xe8   :  { %v197_v31 = vmul.f32 %v624_v30, %v575_v29  ;;  %v305_v30 = vsub.s32 3, %v792_v56 }
  0xe9   :  { %v626_v32 = vpop.eup %625 }
  0xea   :  { %v208_v33 = vsel %vm204_vm1, %v197_v31, 0.0  ;;  %v196_v34 = vmul.f32 %v626_v32, %v575_v29 }
  0xeb   :  { %v628_v35 = vpop.eup %627  ;;  %209 = vadd.xlane.f32.xlu0 %v208_v33 }
  0xec   :  { %v630_v36 = vpop.eup %629  ;;  %v199_v37 = vmul.f32 %v628_v35, %v575_v29  ;;  %v205_v42 = vsel %vm204_vm1, %v196_v34, 0.0  ;;  %v309_v35 = vsub.s32 4, %v792_v56 }
  0xed   :  { %v632_v38 = vpop.eup %631  ;;  %v200_v39 = vmul.f32 %v630_v36, %v575_v29 }
  0xee   :  { %v634_v40 = vpop.eup %633  ;;  %v214_v41 = vsel %vm204_vm1, %v199_v37, 0.0  ;;  %v198_v43 = vmul.f32 %v632_v38, %v575_v29 }
  0xef   :  { %v636_v44 = vpop.eup %635  ;;  %215 = vadd.xlane.f32.xlu1 %v214_v41  ;;  %206 = vadd.xlane.f32.xlu0 %v205_v42  ;;  %v217_v45 = vsel %vm204_vm1, %v200_v39, 0.0  ;;  %v201_v48 = vmul.f32 %v634_v40, %v575_v29  ;;  %v313_v42 = vsub.s32 5, %v792_v56 }
  0xf0   :  { %v202_v46 = vmul.f32 %v636_v44, %v575_v29  ;;  %v211_v47 = vsel %vm204_vm1, %v198_v43, 0.0  ;;  %v638_v49 = vpop.eup %637 }
  0xf1   :  { %v220_v51 = vsel %vm204_vm1, %v201_v48, 0.0  ;;  %v203_v52 = vmul.f32 %v638_v49, %v575_v29  ;;  %v301_v29 = vsub.s32 2, %v792_v56 }
  0xf2   :  { %v223_v50 = vsel %vm204_vm1, %v202_v46, 0.0  ;;  %v317_v46 = vsub.s32 6, %v792_v56 }
  0xf3   :  { %212 = vadd.xlane.f32.xlu1 %v211_v47  ;;  %218 = vadd.xlane.f32.xlu0 %v217_v45  ;;  %v226_v53 = vsel %vm204_vm1, %v203_v52, 0.0 }
  0xf7   :  { %221 = vadd.xlane.f32.xlu1 %v220_v51  ;;  %224 = vadd.xlane.f32.xlu0 %v223_v50  ;;  %v321_v50 = vsub.s32 7, %v792_v56 }
  0xfb   :  { %227 = vadd.xlane.f32.xlu1 %v226_v53 }
 0x174   :  { %v210_v57 = vpop.xlane.xlu0 %209 }
 0x175   :  { %v246_v62 = vrot.slane %v210_v57, %v795_v58 }
 0x178   :  { %v216_v59 = vpop.xlane.xlu1 %215  ;;  %v207_v60 = vpop.xlane.xlu0 %206 }
 0x179   :  { %v242_v61 = vrot.slane %v207_v60, %v795_v58  ;;  %v254_v4 = vrot.slane %v216_v59, %v795_v58 }
 0x17b   :  { %v272_v12 = vsel %vm271_vm2, %v246_v62, %v242_v61 }
 0x17c   :  { %v213_v63 = vpop.xlane.xlu1 %212  ;;  %v219_v0 = vpop.xlane.xlu0 %218 }
 0x17d   :  { %v250_v1 = vrot.slane %v213_v63, %v795_v58  ;;  %v258_v3 = vrot.slane %v219_v0, %v795_v58 }
 0x17f   :  { %v274_v13 = vsel %vm273_vm3, %v250_v1, %v272_v12 }
 0x180   :  { %v276_v14 = vsel %vm275_vm4, %v254_v4, %v274_v13  ;;  %v222_v15 = vpop.xlane.xlu1 %221  ;;  %v225_v16 = vpop.xlane.xlu0 %224 }
 0x181   :  { %v278_v17 = vsel %vm277_vm5, %v258_v3, %v276_v14  ;;  %v262_v18 = vrot.slane %v222_v15, %v795_v58  ;;  %v266_v19 = vrot.slane %v225_v16, %v795_v58 }
 0x183   :  { %v280_v20 = vsel %vm279_vm6, %v262_v18, %v278_v17 }
 0x184   :  { %v228_v21 = vpop.xlane.xlu1 %227  ;;  %v282_v23 = vsel %vm281_vm7, %v266_v19, %v280_v20 }
 0x185   :  { %v270_v22 = vrot.slane %v228_v21, %v795_v58 }
 0x187   :  { %v284_v24 = vsel %vm283_vm8, %v270_v22, %v282_v23 }
 0x188   :  { %v287_v25 = vsel %vm286_vm9, %v284_v24, -inf }
 0x189   :  { %288 = vmax.xlane.f32.xlu0 %v287_v25 }
 0x212   :  { %v289_v31 = vpop.xlane.xlu0 %288 }
 0x213   :  { %v294_v32 = vrot.slane %v289_v31, %v293_v27  ;;  %v298_v33 = vrot.slane %v289_v31, %v297_v28  ;;  %v302_v34 = vrot.slane %v289_v31, %v301_v29  ;;  %v306_v36 = vrot.slane %v289_v31, %v305_v30 }
 0x214   :  { %v310_v43 = vrot.slane %v289_v31, %v309_v35  ;;  %v314_v47 = vrot.slane %v289_v31, %v313_v42  ;;  %v318_v51 = vrot.slane %v289_v31, %v317_v46  ;;  %v322_v54 = vrot.slane %v289_v31, %v321_v50 }
 0x215   :  { %v331_v37 = vsub.f32 %v207_v60, %v294_v32  ;;  %v332_v38 = vsub.f32 %v210_v57, %v298_v33  ;;  %v333_v39 = vsub.f32 %v213_v63, %v302_v34  ;;  %v334_v44 = vsub.f32 %v216_v59, %v306_v36 }
 0x216   :  { %v335_v48 = vsub.f32 %v219_v0, %v310_v43  ;;  %v336_v52 = vsub.f32 %v222_v15, %v314_v47  ;;  %v337_v55 = vsub.f32 %v225_v16, %v318_v51  ;;  %v338_v61 = vsub.f32 %v228_v21, %v322_v54 }
 0x217   :  { %v339_v40 = vmul.f32 1.442695, %v331_v37  ;;  %v341_v41 = vmul.f32 1.442695, %v332_v38  ;;  %v343_v45 = vmul.f32 1.442695, %v333_v39 }
 0x218   :  { %v345_v49 = vmul.f32 1.442695, %v334_v44  ;;  %v347_v53 = vmul.f32 1.442695, %v335_v48  ;;  %v349_v57 = vmul.f32 1.442695, %v336_v52 }
 0x219   :  { %639 = vpow2.f32 %v339_v40  ;;  %v351_v62 = vmul.f32 1.442695, %v337_v55  ;;  %v353_v0 = vmul.f32 1.442695, %v338_v61 }
 0x21a   :  { %641 = vpow2.f32 %v341_v41 }
 0x21b   :  { %643 = vpow2.f32 %v343_v45 }
 0x21c   :  { %645 = vpow2.f32 %v345_v49 }
 0x21d   :  { %647 = vpow2.f32 %v347_v53 }
 0x21e   :  { %649 = vpow2.f32 %v349_v57 }
 0x21f   :  { %651 = vpow2.f32 %v351_v62 }
 0x220   :  { %653 = vpow2.f32 %v353_v0 }
 0x226   :  { %v640_v59 = vpop.eup %639 }
 0x227   :  { %v642_v60 = vpop.eup %641  ;;  %364 = vperm.xlu1 %621, %v640_v59  }
 0x228   :  { %367 = vperm.xlu0 %622, %v642_v60   ;;  %v644_v63 = vpop.eup %643 }
 0x229   :  { %v646_v56 = vpop.eup %645 }
 0x22a   :  { %v648_v1 = vpop.eup %647 }
 0x22b   :  { %370 = vperm.xlu1 %621, %v644_v63   ;;  %v650_v3 = vpop.eup %649 }
 0x22c   :  { %v652_v4 = vpop.eup %651 }
 0x22d   :  { %v654_v12 = vpop.eup %653 }
 0x22f   :  { %373 = vperm.xlu1 %621, %v646_v56  }
 0x233   :  { %376 = vperm.xlu1 %621, %v648_v1  }
 0x237   :  { %379 = vperm.xlu1 %621, %v650_v3  }
 0x23b   :  { %382 = vperm.xlu1 %621, %v652_v4  }
 0x23f   :  { %385 = vperm.xlu1 %621, %v654_v12  }
 0x2a2   :  { %v365_v13 = vpop.permute.xlu1 %364 }
 0x2a3   :  { %v368_v17 = vpop.permute.xlu0 %367  ;;  %v390_v20 = vrot.slane %v365_v13, %v795_v58  ;;  %v438_v38 = vmul.f32 %v365_v13, %v740_v2 }
 0x2a4   :  { %v394_v19 = vrot.slane %v368_v17, %v795_v58  ;;  %v439_v37 = vmul.f32 %v368_v17, %v750_v5 }
 0x2a5   :  { %v446_v43 = vsel %vm51_vm0, %v438_v38, 0.0 }
 0x2a6   :  { %v371_v14 = vpop.permute.xlu1 %370  ;;  %v419_v25 = vsel %vm271_vm2, %v394_v19, %v390_v20  ;;  %v453_v42 = vsel %vm51_vm0, %v439_v37, 0.0 }
 0x2a7   :  { %v398_v21 = vrot.slane %v371_v14, %v795_v58  ;;  %v440_v39 = vmul.f32 %v371_v14, %v752_v6  ;;  %v454_v46 = vrot.slane %v453_v42, 4  ;;  %v447_v6 = vrot.slane %v446_v43, 4 }
 0x2a9   :  { %v420_v27 = vsel %vm273_vm3, %v398_v21, %v419_v25  ;;  %v460_v44 = vsel %vm51_vm0, %v440_v39, 0.0  ;;  %v455_v52 = vadd.f32 %v454_v46, %v453_v42  ;;  %v448_v53 = vadd.f32 %v447_v6, %v446_v43 }
 0x2aa   :  { %v374_v15 = vpop.permute.xlu1 %373  ;;  %v461_v47 = vrot.slane %v460_v44, 4 }
 0x2ab   :  { %v402_v22 = vrot.slane %v374_v15, %v795_v58  ;;  %v441_v40 = vmul.f32 %v374_v15, %v764_v10  ;;  %v456_v61 = vrot.slane %v455_v52, 2  ;;  %v449_v62 = vrot.slane %v448_v53, 2 }
 0x2ac   :  { %v462_v54 = vadd.f32 %v461_v47, %v460_v44 }
 0x2ad   :  { %v421_v29 = vsel %vm275_vm4, %v402_v22, %v420_v27  ;;  %v467_v45 = vsel %vm51_vm0, %v441_v40, 0.0  ;;  %v457_v12 = vadd.f32 %v456_v61, %v455_v52  ;;  %v450_v13 = vadd.f32 %v449_v62, %v448_v53 }
 0x2ae   :  { %v377_v16 = vpop.permute.xlu1 %376  ;;  %v463_v63 = vrot.slane %v462_v54, 2 }
 0x2af   :  { %v406_v23 = vrot.slane %v377_v16, %v795_v58  ;;  %v442_v41 = vmul.f32 %v377_v16, %v754_v7  ;;  %v458_v20 = vrot.slane %v457_v12, 1  ;;  %v451_v21 = vrot.slane %v450_v13, 1 }
 0x2b0   :  { %v464_v14 = vadd.f32 %v463_v63, %v462_v54 }
 0x2b1   :  { %v422_v30 = vsel %vm277_vm5, %v406_v23, %v421_v29  ;;  %v474_v10 = vsel %vm51_vm0, %v442_v41, 0.0  ;;  %v452_v29 = vadd.f32 %v451_v21, %v450_v13 }
 0x2b2   :  { %v380_v18 = vpop.permute.xlu1 %379  ;;  %v475_v50 = vrot.slane %v474_v10, 4  ;;  %v465_v22 = vrot.slane %v464_v14, 1 }
 0x2b3   :  { %v410_v26 = vrot.slane %v380_v18, %v795_v58 }
 0x2b4   :  { %v476_v57 = vadd.f32 %v475_v50, %v474_v10 }
 0x2b5   :  { %v423_v33 = vsel %vm279_vm6, %v410_v26, %v422_v30 }
 0x2b6   :  { %v383_v24 = vpop.permute.xlu1 %382  ;;  %v477_v3 = vrot.slane %v476_v57, 2 }
 0x2b7   :  { %v414_v28 = vrot.slane %v383_v24, %v795_v58  ;;  %v444_v5 = vmul.f32 %v383_v24, %v760_v9 }
 0x2b9   :  { %v424_v34 = vsel %vm281_vm7, %v414_v28, %v423_v33  ;;  %v488_v48 = vsel %vm51_vm0, %v444_v5, 0.0  ;;  %v459_v28 = vadd.f32 %v458_v20, %v457_v12 }
 0x2ba   :  { %v386_v31 = vpop.permute.xlu1 %385  ;;  %v489_v55 = vrot.slane %v488_v48, 4 }
 0x2bb   :  { %v418_v32 = vrot.slane %v386_v31, %v795_v58  ;;  %v443_v58 = vmul.f32 %v380_v18, %v756_v8  ;;  %v445_v2 = vmul.f32 %v386_v31, %v772_v11  ;;  %v468_v8 = vrot.slane %v467_v45, 4 }
 0x2bc   :  { %v490_v56 = vadd.f32 %v489_v55, %v488_v48  ;;  %v478_v18 = vadd.f32 %v477_v3, %v476_v57  ;;  %v466_v31 = vadd.f32 %v465_v22, %v464_v14 }
 0x2bd   :  { %v425_v35 = vsel %vm283_vm8, %v418_v32, %v424_v34  ;;  %v481_v7 = vsel %vm51_vm0, %v443_v58, 0.0  ;;  %v495_v49 = vsel %vm51_vm0, %v445_v2, 0.0  ;;  %v469_v9 = vadd.f32 %v468_v8, %v467_v45 }
 0x2be   :  { %v427_v36 = vsel %vm286_vm9, %v425_v35, 0.0  ;;  %v482_v51 = vrot.slane %v481_v7, 4  ;;  %v496_v11 = vrot.slane %v495_v49, 4  ;;  %v491_v16 = vrot.slane %v490_v56, 2 }
 0x2bf   :  { %428 = vadd.xlane.f32.xlu1 %v427_v36  ;;  %v470_v0 = vrot.slane %v469_v9, 2  ;;  %v479_v26 = vrot.slane %v478_v18, 1 }
 0x2c0   :  { %v483_v59 = vadd.f32 %v482_v51, %v481_v7  ;;  %v497_v1 = vadd.f32 %v496_v11, %v495_v49  ;;  %v492_v24 = vadd.f32 %v491_v16, %v490_v56 }
 0x2c1   :  { %v471_v15 = vadd.f32 %v470_v0, %v469_v9  ;;  %v480_v39 = vadd.f32 %v479_v26, %v478_v18 }
 0x2c2   :  { %v484_v4 = vrot.slane %v483_v59, 2  ;;  %v498_v17 = vrot.slane %v497_v1, 2  ;;  %v493_v33 = vrot.slane %v492_v24, 1 }
 0x2c3   :  { %v472_v23 = vrot.slane %v471_v15, 1 }
 0x2c4   :  { %v485_v19 = vadd.f32 %v484_v4, %v483_v59  ;;  %v499_v25 = vadd.f32 %v498_v17, %v497_v1  ;;  %v494_v5 = vadd.f32 %v493_v33, %v492_v24 }
 0x2c5   :  { %v473_v32 = vadd.f32 %v472_v23, %v471_v15 }
 0x2c6   :  { %v486_v27 = vrot.slane %v485_v19, 1  ;;  %v500_v34 = vrot.slane %v499_v25, 1 }
 0x2c8   :  { %v487_v40 = vadd.f32 %v486_v27, %v485_v19  ;;  %v501_v2 = vadd.f32 %v500_v34, %v499_v25 }
 0x348   :  { %v429_v60 = vpop.xlane.xlu1 %428 }
 0x349   :  { %655 = vrcp.f32 %v429_v60 }
 0x356   :  { %v656_v30 = vpop.eup %655 }
 0x357   :  { %v504_v35 = vrot.slane %v656_v30, 1  ;;  %v505_v36 = vrot.slane %v656_v30, 2  ;;  %v506_v37 = vrot.slane %v656_v30, 3  ;;  %v507_v38 = vrot.slane %v656_v30, 4 }
 0x358   :  { %v508_v41 = vrot.slane %v656_v30, 5  ;;  %v509_v58 = vrot.slane %v656_v30, 6  ;;  %v510_v42 = vrot.slane %v656_v30, 7  ;;  %v519_v6 = vmul.f32 %v656_v30, %v452_v29 }
 0x359   :  { %v520_v43 = vmul.f32 %v504_v35, %v459_v28  ;;  %v521_v44 = vmul.f32 %v505_v36, %v466_v31  ;;  %v522_v45 = vmul.f32 %v506_v37, %v473_v32  ;;  %v523_v46 = vmul.f32 %v507_v38, %v480_v39 }
 0x35a   :  { %v524_v10 = vmul.f32 %v508_v41, %v487_v40  ;;  %v525_v8 = vmul.f32 %v509_v58, %v494_v5  ;;  %v526_v48 = vmul.f32 %v510_v42, %v501_v2 }
 0x35b   :  { %v535_v7 = vrot.slane %v520_v43, 7  ;;  %v537_v47 = vrot.slane %v521_v44, 6  ;;  %v539_v50 = vrot.slane %v522_v45, 5  ;;  %v541_v52 = vrot.slane %v523_v46, 4 }
 0x35c   :  { %v543_v54 = vrot.slane %v524_v10, 3  ;;  %v545_v55 = vrot.slane %v525_v8, 2  ;;  %v547_v57 = vrot.slane %v526_v48, 1 }
 0x35d   :  { %v536_v49 = vsel %vm271_vm2, %v535_v7, %v519_v6 }
 0x35e   :  { %v538_v51 = vsel %vm273_vm3, %v537_v47, %v536_v49 }
 0x35f   :  { %v540_v53 = vsel %vm275_vm4, %v539_v50, %v538_v51 }
 0x360   :  { %v542_v9 = vsel %vm277_vm5, %v541_v52, %v540_v53 }
 0x361   :  { %v544_v11 = vsel %vm279_vm6, %v543_v54, %v542_v9 }
 0x362   :  { %v546_v59 = vsel %vm281_vm7, %v545_v55, %v544_v11 }
 0x363   :  { %v548_v60 = vsel %vm283_vm8, %v547_v57, %v546_v59 }
 0x364   :  { %550 = vst.msk [vmem:[#allocation5] sm:$0xff] %vm51_vm0, %v548_v60 }
 0x365   :  { %688 = shalt.err (!%p685_p9)
}
 0x366   :  { %560 = dma.vmem_to_hbm [thread:$0]  %s558_s5, 128, %s868_s4, [#allocation4]  }
 0x367   :  { %699 = dma.done.wait [#allocation4], 128  }
 0x368   :  { %700 = vsyncadd [#allocation4], 4294967168 }
 0x369   :  { %564 = vsyncpa [#allocation3], 1 }
 0x36a   :  { %565 = vsyncpa [#allocation4], 1 }

</bundles_post_ra>
